<compile_context>
chip_gen: v5e
topology: v5e:2x2
jax: 0.10.0
libtpu: 0.0.40
codegen_flags: <defaults>
</compile_context>

<pallas_src>
import jax
import jax.numpy as jnp
from jax.experimental import pallas as pl
from jax.experimental.pallas import tpu as pltpu

LANE = 128


def gcn_kernel(x_ref, a_ref, w_ref, b_ref, o_ref):
    """Single-invocation GCN layer, fully 2-D and lane-dense on the output.

    x_ref: (M, F)   flattened node features, M = B*N, true (unpadded) F
    a_ref: (M, M)   block-diagonal adjacency (diagonal block b = A[b])
    w_ref: (F, Fp)  weight, output columns zero-padded to a 128 multiple
    b_ref: (1, Fp)  bias, zero-padded
    o_ref: (M, Fp)  output (128-lane wide -> unmasked vst stores)
    """
    # Fused X @ W across the whole batch: one (M, F) x (F, Fp) MXU dot
    # (K = F = 65 is padded internally by Mosaic).
    xw = jnp.dot(x_ref[...], w_ref[...], preferred_element_type=jnp.float32)
    # Single fused (M, M) x (M, Fp) dot instead of B tiny batched matmuls.
    out = jnp.dot(a_ref[...], xw, preferred_element_type=jnp.float32)
    out = jnp.maximum(out + b_ref[...], 0.0)      # bias + ReLU epilogue in f32
    o_ref[...] = out.astype(o_ref.dtype)


def prepare_params(weight, bias):
    """One-time (init) padding of the parameters -- NOT on the per-call path."""
    f_in, f_out = weight.shape
    fp = LANE * pl.cdiv(f_out, LANE)
    w_pad = jnp.pad(weight, ((0, 0), (0, fp - f_out)))     # pad output cols only
    b_pad = jnp.pad(bias, ((0, fp - f_out),)).reshape(1, fp)
    return w_pad, b_pad


def block_diag_mask(batch, nodes):
    """Constant (B*N, B*N) boolean mask selecting the per-batch diagonal blocks."""
    m = batch * nodes
    blk = jnp.arange(m) // nodes
    return blk[:, None] == blk[None, :]


def gcn_forward(x, a, w_pad, b_pad, blk_mask):
    """Returns (padded activations (B, N, Fp), A).

    Activations stay padded to Fp = 128 lanes so stacked GCN layers remain
    lane-dense; slice [..., :F] once at the end of the network.
    """
    B, N, F = x.shape
    M = B * N
    Fp = w_pad.shape[1]

    # Free (metadata-only) leading-dim merge; no HBM pass.
    x2d = x.reshape(M, F)

    # Block-diagonal adjacency (mask is a hoisted constant; tile+where fuses to
    # one tiny XLA op).  In-kernel alternative: two broadcasted_iota masks.
    a_bd = jnp.where(blk_mask, jnp.tile(a.reshape(M, N), (1, B)), 0.0)

    itemsize = jnp.dtype(x.dtype).itemsize
    cost = pl.CostEstimate(
        flops=2 * B * N * F * F + 2 * B * N * N * F,   # true (unpadded) work
        transcendentals=0,
        bytes_accessed=(x2d.size + a_bd.size + w_pad.size + b_pad.size
                        + M * Fp) * itemsize,
    )

    out2d = pl.pallas_call(
        gcn_kernel,
        out_shape=jax.ShapeDtypeStruct((M, Fp), x.dtype),
        # No grid: whole problem resident in VMEM for a single invocation.
        in_specs=[
            pl.BlockSpec(memory_space=pltpu.MemorySpace.VMEM),  # X  (M, F)
            pl.BlockSpec(memory_space=pltpu.MemorySpace.VMEM),  # A  (M, M) block-diag
            pl.BlockSpec(memory_space=pltpu.MemorySpace.VMEM),  # W  (F, Fp)
            pl.BlockSpec(memory_space=pltpu.MemorySpace.VMEM),  # b  (1, Fp)
        ],
        out_specs=pl.BlockSpec(memory_space=pltpu.MemorySpace.VMEM),
        cost_estimate=cost,
    )(x2d, a_bd, w_pad, b_pad)

    return out2d.reshape(B, N, Fp), a


if __name__ == "__main__":
    key = jax.random.PRNGKey(0)
    k_w, k_x, k_a = jax.random.split(key, 3)

    B, N, F = 2, 8, 65   # F = 65 matches the module's weight/bias shapes

    # Parameter init (mirrors torch.randn / torch.zeros), padded ONCE at init.
    weight = jax.random.normal(k_w, (F, F), dtype=jnp.float32)
    bias = jnp.zeros((F,), dtype=jnp.float32)
    w_pad, b_pad = prepare_params(weight, bias)
    blk_mask = block_diag_mask(B, N)          # constant for fixed (B, N)

    # Example inputs: node features X and adjacency A.
    x = jax.random.normal(k_x, (B, N, F), dtype=jnp.float32)
    a = jax.random.normal(k_a, (B, N, N), dtype=jnp.float32)

    fwd = jax.jit(gcn_forward)
    out_pad, a_out = fwd(x, a, w_pad, b_pad, blk_mask)
    out_pad = jax.block_until_ready(out_pad)

    # End-of-network slice back to the module's true feature width (done once
    # here; intermediate layers would keep the padded 128-lane activations).
    out = out_pad[..., :F]

    # Reference check in plain JAX.
    ref = jnp.maximum(
        jnp.einsum("bij,bjf->bif", a,
                   jnp.einsum("bnf,fg->bng", x, weight)) + bias,
        0.0,
    )
    assert jnp.allclose(out, ref, atol=1e-4, rtol=1e-4), "mismatch vs reference"
    assert jnp.array_equal(a_out, a)
    # Padded lanes must stay exactly zero so stacking padded layers is exact.
    assert jnp.all(out_pad[..., F:] == 0.0)

    print("KERNEL_OK")
</pallas_src>

<mosaic_0001>
module attributes {stable_mosaic.version = 11 : i64} {
  func.func @gcn_kernel(%arg0: memref<16x65xf32, #tpu.memory_space<vmem>>, %arg1: memref<16x16xf32, #tpu.memory_space<vmem>>, %arg2: memref<65x128xf32, #tpu.memory_space<vmem>>, %arg3: memref<1x128xf32, #tpu.memory_space<vmem>>, %arg4: memref<16x128xf32, #tpu.memory_space<vmem>>) attributes {dimension_semantics = [], scalar_prefetch = 0 : i64, scratch_operands = 0 : i64, tpu.core_type = #tpu.core_type<tc>} {
    %c0 = arith.constant 0 : index
    %c0_0 = arith.constant 0 : index
    %0 = vector.load %arg0[%c0, %c0_0] : memref<16x65xf32, #tpu.memory_space<vmem>>, vector<16x65xf32>
    %c0_1 = arith.constant 0 : index
    %c0_2 = arith.constant 0 : index
    %1 = vector.load %arg2[%c0_1, %c0_2] : memref<65x128xf32, #tpu.memory_space<vmem>>, vector<65x128xf32>
    %cst = arith.constant dense<0.000000e+00> : vector<16x128xf32>
    %2 = tpu.matmul %0, %1, %cst {dimension_numbers = #tpu.dot_dimension_numbers<[1], [0], [0], [1], [0, 0, 1, 1], [], []>} : vector<16x65xf32>, vector<65x128xf32>, vector<16x128xf32> -> vector<16x128xf32>
    %c0_3 = arith.constant 0 : index
    %c0_4 = arith.constant 0 : index
    %3 = vector.load %arg1[%c0_3, %c0_4] : memref<16x16xf32, #tpu.memory_space<vmem>>, vector<16x16xf32>
    %cst_5 = arith.constant dense<0.000000e+00> : vector<16x128xf32>
    %4 = tpu.matmul %3, %2, %cst_5 {dimension_numbers = #tpu.dot_dimension_numbers<[1], [0], [0], [1], [0, 0, 1, 1], [], []>} : vector<16x16xf32>, vector<16x128xf32>, vector<16x128xf32> -> vector<16x128xf32>
    %c0_6 = arith.constant 0 : index
    %c0_7 = arith.constant 0 : index
    %5 = vector.load %arg3[%c0_6, %c0_7] : memref<1x128xf32, #tpu.memory_space<vmem>>, vector<1x128xf32>
    %6 = vector.broadcast %5 : vector<1x128xf32> to vector<16x128xf32>
    %7 = arith.addf %4, %6 : vector<16x128xf32>
    %cst_8 = arith.constant 0.000000e+00 : f32
    %8 = vector.broadcast %cst_8 : f32 to vector<16x128xf32>
    %9 = arith.maximumf %7, %8 : vector<16x128xf32>
    %c0_9 = arith.constant 0 : index
    %c0_10 = arith.constant 0 : index
    %10 = vector.load %arg4[%c0_9, %c0_10] : memref<16x128xf32, #tpu.memory_space<vmem>>, vector<16x128xf32>
    tpu.vector_store %arg4[%c0_9, %c0_10], %9 {strides = array<i32>} : memref<16x128xf32, #tpu.memory_space<vmem>>, vector<16x128xf32>,
    return
  }
}

</mosaic_0001>

<bundles_post_ra>
// kernel: gcn_forward.1
= control target key start
LH: loop header
LB: loop body
LE: loop exit
PB: predicated region body
PF: predicated region fallthrough
CT: control target
= control target key end

     0   :  { %vm36_vm0 = vcmask 1040384   ;;  %s238_s0 = inlined_call_operand.vmem [shape: f32[16,65], index: 0, kind: input, shape index: {}]   ;;  %s239_s1 = inlined_call_operand.vmem [shape: f32[16,16], index: 1, kind: input, shape index: {}]   ;;  %s240_s2 = inlined_call_operand.vmem [shape: f32[65,128], index: 2, kind: input, shape index: {}]   ;;  %s241_s3 = inlined_call_operand.vmem [shape: f32[1,128], index: 3, kind: input, shape index: {}]   ;;  %s242_s4 = inlined_call_operand.hbm [shape: f32[16,128], index: 4, kind: output, shape index: {}]  }
   0x1   :  { %v28_v0 = vld [vmem:[%s240_s2 + $0x40] sm:$0x1]  ;;  %v27_v1 = vld [vmem:[%s240_s2 + $0x38] sm:$0xff]  ;;  %v26_v2 = vld [vmem:[%s240_s2 + $0x30] sm:$0xff] }
   0x2   :  { %126 = vmatpush.msk.msra.mxu2 %vm36_vm0, %v28_v0  ;;  %121 = vmatpush.msk.msra.mxu0 %vm36_vm0, %v28_v0  ;;  %v25_v3 = vld [vmem:[%s240_s2 + $0x28] sm:$0xff] }
   0x4   :  { %127 = vmatpush.msra.mxu2 %v27_v1  ;;  %48 = vmatpush.msra.mxu0 %v27_v1 }
   0x5   :  { %9 = vsyncpa [#allocation3], 0  ;;  %v24_v4 = vld [vmem:[%s240_s2 + $0x20] sm:$0xff]  ;;  %v23_v5 = vld [vmem:[%s240_s2 + $0x18] sm:$0xff]  ;;  %vm29_vm1 = vcmask 531456   ;;  %vm69_vm2 = vcmask 130048  }
   0x6   :  { %128 = vmatpush.msra.mxu2 %v26_v2  ;;  %49 = vmatpush.msra.mxu0 %v26_v2  ;;  %v22_v6 = vld [vmem:[%s240_s2 + $0x10] sm:$0xff]  ;;  %v21_v7 = vld [vmem:[%s240_s2 + $0x8] sm:$0xff]  ;;  %v20_v8 = vld [vmem:[%s240_s2] sm:$0xff]  ;;  %s165_s15 = smov [#allocation2]   ;;  %s109_s19 = sshll.u32 %s242_s4, 4  ;;  %s110_s19 = int_to_ptr.hbm [resolvable:$true] %s109_s19 }
   0x7   :  { %v19_v9 = vld [vmem:[%s238_s0 + $0x8] sm:$0xff]  ;;  %v18_v10 = vld [vmem:[%s238_s0] sm:$0xff]  ;;  %s107_s16 = sshll.u32 %s165_s15, 4  ;;  %s167_s20 = smov 8   ;;  %s108_s16 = int_to_ptr.vmem [resolvable:$true] %s107_s16 }
   0x8   :  { %129 = vmatpush.msra.mxu2 %v25_v3  ;;  %50 = vmatpush.msra.mxu0 %v25_v3  ;;  %v63_v13 = vld [vmem:[%s239_s1] sm:$0xff]  ;;  %v64_v14 = vld [vmem:[%s239_s1 + $0x8] sm:$0xff]  ;;  %s166_s1 = smov 128  }
   0x9   :  { %v138_v15 = vld [vmem:[%s241_s3] ss:$0 sm:$0xff] }
   0xa   :  { %130 = vmatpush.msra.mxu2 %v24_v4  ;;  %51 = vmatpush.msra.mxu0 %v24_v4 }
   0xc   :  { %131 = vmatpush.msra.mxu2 %v23_v5  ;;  %52 = vmatpush.msra.mxu0 %v23_v5 }
   0xe   :  { %132 = vmatpush.msra.mxu2 %v22_v6  ;;  %53 = vmatpush.msra.mxu0 %v22_v6 }
  0x10   :  { %133 = vmatpush.msra.mxu2 %v21_v7  ;;  %54 = vmatpush.msra.mxu0 %v21_v7 }
  0x12   :  { %134 = vmatpush.msra.mxu2 %v20_v8  ;;  %55 = vmatpush.msra.mxu0 %v20_v8 }
  0x13   :  { %123 = vmatmul.msk.f32.vlgmr.msra.gmra.mxu2 %vm29_vm1, %v19_v9  ;;  %122 = vmatmul.msk.f32.vlgmr.msra.gmra.mxu0 %vm29_vm1, %v18_v10 }
  0x90   :  { %v57_v12 = vpop.f32.mrf.mxu0 }
  0x96   :  { %v60_v11 = vpop.f32.mrf.mxu2 }
  0x97   :  { %90 = vmatpush.msra.mxu1 %v60_v11 }
  0x99   :  { %91 = vmatpush.msra.mxu1 %v57_v12 }
  0x9a   :  { %124 = vmatmul.msk.f32.vlgmr.msra.gmra.mxu1 %vm69_vm2, %v63_v13 }
  0xa2   :  { %125 = vmatmul.msk.f32.gmra.mxu1 %vm69_vm2, %v64_v14 }
 0x117   :  { %v93_v16 = vpop.f32.mrf.mxu1 }
 0x118   :  { %v94_v17 = vadd.f32 %v138_v15, %v93_v16 }
 0x11a   :  { %v99_v18 = vmax.f32 %v94_v17, 0.0 }
 0x11c   :  { %101 = vst [vmem:[#allocation2] sm:$0xff] %v99_v18 }
 0x11f   :  { %v96_v19 = vpop.f32.mrf.mxu1 }
 0x120   :  { %v97_v20 = vadd.f32 %v138_v15, %v96_v19 }
 0x122   :  { %v100_v21 = vmax.f32 %v97_v20, 0.0 }
 0x124   :  { %102 = vst [vmem:[#allocation2 + $0x8] sm:$0xff] %v100_v21 }
 0x125   :  { %115 = dma.vmem_to_hbm [thread:$0]  %s108_s16, 256, %s110_s19, [#allocation3], %s166_s1, %s166_s1, %s167_s20  }
 0x126   :  { %163 = dma.done.wait [#allocation3], 256  }
 0x127   :  { %164 = vsyncadd [#allocation3], 4294967040 }
 0x128   :  { %120 = vsyncpa [#allocation3], 1 }

</bundles_post_ra>
